<compile_context>
chip_gen: v6e
topology: v6e:2x2x1
jax: 0.10.0
libtpu: 0.0.40
codegen_flags: <defaults>
</compile_context>

<pallas_src>
import functools

import jax
import jax.numpy as jnp
from jax.experimental import pallas as pl
from jax.experimental.pallas import tpu as pltpu

IN_FEATURES = 7    # layer-1 input features (Mosaic pads the K=7 contraction)
HIDDEN = 512       # hidden width
OUT_FEATURES = 2   # true output width (masked 2-lane stores; store slot has slack)


def _round_up(x, m):
    return (x + m - 1) // m * m


def _choose_tile(batch, tm_max):
    """Batch tile: large enough to amortize the ~0.35 us per-grid-step overhead,
    small enough that the grid has >= 2 steps (v7x megacore sharding of the
    'parallel' batch axis), 128-row aligned when the batch allows it."""
    half = -(-batch // 2)                    # ceil(batch / 2)
    align = 128 if half >= 128 else 8
    return max(min(tm_max, _round_up(half, align)), 8)


def mlp_kernel(x_ref, w1_ref, b1_ref, w2_ref, b2_ref, w3_ref, b3_ref, o_ref):
    # Layer 1: Linear(7->512) + ReLU.  bf16 operands into the MXU (Mosaic
    # zero-pads the K=7 contraction internally), f32 accumulation.
    x = x_ref[...].astype(jnp.bfloat16)                                # (TM, 7)
    h1 = jnp.dot(x, w1_ref[...], preferred_element_type=jnp.float32)  # (TM, 512)
    h1 = jnp.maximum(h1 + b1_ref[...], 0.0)
    # Layer 2: Linear(512->512) + ReLU.
    h2 = jnp.dot(h1.astype(jnp.bfloat16), w2_ref[...],
                 preferred_element_type=jnp.float32)
    h2 = jnp.maximum(h2 + b2_ref[...], 0.0)
    # Layer 3: Linear(512->2), true-width output (masked (TM,2) store).
    logits = jnp.dot(h2.astype(jnp.bfloat16), w3_ref[...],
                     preferred_element_type=jnp.float32)
    o_ref[...] = (logits + b3_ref[...]).astype(o_ref.dtype)


def prepare_params(w1, b1, w2, b2, w3, b3):
    """One-time re-layout: weights -> bf16, biases -> (1, fan_out) f32.

    Weights are expected in (in, out) layout (forward is x @ W).  Loading a
    real PyTorch nn.Linear checkpoint ((out, in)) requires transposing here.
    """
    return (w1.astype(jnp.bfloat16), b1.reshape(1, -1).astype(jnp.float32),
            w2.astype(jnp.bfloat16), b2.reshape(1, -1).astype(jnp.float32),
            w3.astype(jnp.bfloat16), b3.reshape(1, -1).astype(jnp.float32))


@functools.partial(jax.jit, static_argnames=("tm",))
def neural_network_forward(x, params, *, tm=1024):
    """x: (B, ...) flattening to 7 features -> logits (B, 2) float32."""
    w1, b1, w2, b2, w3, b3 = params
    B = x.shape[0]
    x = x.reshape(B, -1).astype(jnp.float32)          # nn.Flatten
    assert x.shape[1] == IN_FEATURES

    tile = _choose_tile(B, tm)
    grid = (pl.cdiv(B, tile),)   # ragged last tile handled by Pallas (rows independent)

    const = lambda a: pl.BlockSpec(a.shape, lambda i: (0,) * a.ndim)
    return pl.pallas_call(
        mlp_kernel,
        out_shape=jax.ShapeDtypeStruct((B, OUT_FEATURES), jnp.float32),
        grid_spec=pltpu.PrefetchScalarGridSpec(
            num_scalar_prefetch=0,
            grid=grid,
            in_specs=[
                pl.BlockSpec((tile, IN_FEATURES), lambda i: (i, 0)),  # x tile per step
                const(w1), const(b1),     # params stay VMEM-resident across steps
                const(w2), const(b2),
                const(w3), const(b3),
            ],
            out_specs=pl.BlockSpec((tile, OUT_FEATURES), lambda i: (i, 0)),
        ),
        compiler_params=pltpu.CompilerParams(
            dimension_semantics=("parallel",),   # megacore-shard batch on v7x
        ),
    )(x, w1, b1, w2, b2, w3, b3)


def init_params(key):
    """Deterministic PyTorch-style init: U(-1/sqrt(fan_in), 1/sqrt(fan_in))."""
    def linear(k, fan_in, fan_out):
        kw, kb = jax.random.split(k)
        bound = 1.0 / jnp.sqrt(fan_in)
        # stored as (in, out) so the forward is x @ W (== x @ W_torch.T)
        w = jax.random.uniform(kw, (fan_in, fan_out), jnp.float32, -bound, bound)
        b = jax.random.uniform(kb, (1, fan_out), jnp.float32, -bound, bound)
        return w, b

    k1, k2, k3 = jax.random.split(key, 3)
    w1, b1 = linear(k1, IN_FEATURES, HIDDEN)
    w2, b2 = linear(k2, HIDDEN, HIDDEN)
    w3, b3 = linear(k3, HIDDEN, OUT_FEATURES)
    return w1, b1, w2, b2, w3, b3


def _reference(x, params_f32):
    w1, b1, w2, b2, w3, b3 = params_f32
    h1 = jnp.maximum(x @ w1 + b1, 0.0)
    h2 = jnp.maximum(h1 @ w2 + b2, 0.0)
    return h2 @ w3 + b3


if __name__ == "__main__":
    key = jax.random.PRNGKey(0)
    kx1, kx2, kx3, kp = jax.random.split(key, 4)

    params_f32 = init_params(kp)
    params = prepare_params(*params_f32)

    # bf16 weights/activations into the MXU -> looser tolerance vs f32 reference.
    ATOL = RTOL = 5e-2

    # Case 1: tiny batch (B=8), single grid step.
    B1 = 8
    x1 = jax.random.normal(kx1, (B1, IN_FEATURES), jnp.float32)
    out1 = jax.block_until_ready(neural_network_forward(x1, params))
    assert out1.shape == (B1, OUT_FEATURES)
    assert jnp.allclose(out1, _reference(x1, params_f32), atol=ATOL, rtol=RTOL)

    # Case 2: ragged batch with explicit tiny tile (B=20, tm=8 -> grid of 3,
    # last tile has 4 valid rows) to exercise multi-step + ragged handling.
    B2 = 20
    x2 = jax.random.normal(kx2, (B2, IN_FEATURES), jnp.float32)
    out2 = jax.block_until_ready(neural_network_forward(x2, params, tm=8))
    assert out2.shape == (B2, OUT_FEATURES)
    assert jnp.allclose(out2, _reference(x2, params_f32), atol=ATOL, rtol=RTOL)

    # Case 3: default tiling path (B=200 -> tile=104, 2 grid steps, ragged
    # second tile) to exercise the >=2-step / weight-residency path.
    B3 = 200
    x3 = jax.random.normal(kx3, (B3, IN_FEATURES), jnp.float32)
    out3 = jax.block_until_ready(neural_network_forward(x3, params))
    assert out3.shape == (B3, OUT_FEATURES)
    assert jnp.allclose(out3, _reference(x3, params_f32), atol=ATOL, rtol=RTOL)

    print("KERNEL_OK")
</pallas_src>

<mosaic_0001>
module attributes {stable_mosaic.version = 11 : i64} {
  func.func @mlp_kernel(%arg0: i32, %arg1: memref<8x7xf32, #tpu.memory_space<vmem>>, %arg2: memref<7x512xbf16, #tpu.memory_space<vmem>>, %arg3: memref<1x512xf32, #tpu.memory_space<vmem>>, %arg4: memref<512x512xbf16, #tpu.memory_space<vmem>>, %arg5: memref<1x512xf32, #tpu.memory_space<vmem>>, %arg6: memref<512x2xbf16, #tpu.memory_space<vmem>>, %arg7: memref<1x2xf32, #tpu.memory_space<vmem>>, %arg8: memref<8x2xf32, #tpu.memory_space<vmem>>) attributes {dimension_semantics = [#tpu.dimension_semantics<parallel>], iteration_bounds = array<i64: 1>, scalar_prefetch = 0 : i64, scratch_operands = 0 : i64, tpu.core_type = #tpu.core_type<tc>, window_params = [{transform_indices = @transform_0, window_bounds = array<i64: 8, 7>}, {pipeline_mode = #tpu.pipeline_mode<synchronous>, transform_indices = @transform_1, window_bounds = array<i64: 7, 512>}, {pipeline_mode = #tpu.pipeline_mode<synchronous>, transform_indices = @transform_2, window_bounds = array<i64: 1, 512>}, {pipeline_mode = #tpu.pipeline_mode<synchronous>, transform_indices = @transform_3, window_bounds = array<i64: 512, 512>}, {pipeline_mode = #tpu.pipeline_mode<synchronous>, transform_indices = @transform_4, window_bounds = array<i64: 1, 512>}, {pipeline_mode = #tpu.pipeline_mode<synchronous>, transform_indices = @transform_5, window_bounds = array<i64: 512, 2>}, {pipeline_mode = #tpu.pipeline_mode<synchronous>, transform_indices = @transform_6, window_bounds = array<i64: 1, 2>}, {transform_indices = @transform_7, window_bounds = array<i64: 8, 2>}]} {
    %c0 = arith.constant 0 : index
    %c0_0 = arith.constant 0 : index
    %0 = vector.load %arg1[%c0, %c0_0] : memref<8x7xf32, #tpu.memory_space<vmem>>, vector<8x7xf32>
    %1 = arith.truncf %0 : vector<8x7xf32> to vector<8x7xbf16>
    %c0_1 = arith.constant 0 : index
    %c0_2 = arith.constant 0 : index
    %2 = vector.load %arg2[%c0_1, %c0_2] : memref<7x512xbf16, #tpu.memory_space<vmem>>, vector<7x512xbf16>
    %cst = arith.constant dense<0.000000e+00> : vector<8x512xf32>
    %3 = tpu.matmul %1, %2, %cst {dimension_numbers = #tpu.dot_dimension_numbers<[1], [0], [0], [1], [0, 0, 1, 1], [], []>} : vector<8x7xbf16>, vector<7x512xbf16>, vector<8x512xf32> -> vector<8x512xf32>
    %c0_3 = arith.constant 0 : index
    %c0_4 = arith.constant 0 : index
    %4 = vector.load %arg3[%c0_3, %c0_4] : memref<1x512xf32, #tpu.memory_space<vmem>>, vector<1x512xf32>
    %5 = vector.broadcast %4 : vector<1x512xf32> to vector<8x512xf32>
    %6 = arith.addf %3, %5 : vector<8x512xf32>
    %cst_5 = arith.constant 0.000000e+00 : f32
    %7 = vector.broadcast %cst_5 : f32 to vector<8x512xf32>
    %8 = arith.maximumf %6, %7 : vector<8x512xf32>
    %9 = arith.truncf %8 : vector<8x512xf32> to vector<8x512xbf16>
    %c0_6 = arith.constant 0 : index
    %c0_7 = arith.constant 0 : index
    %10 = vector.load %arg4[%c0_6, %c0_7] : memref<512x512xbf16, #tpu.memory_space<vmem>>, vector<512x512xbf16>
    %cst_8 = arith.constant dense<0.000000e+00> : vector<8x512xf32>
    %11 = tpu.matmul %9, %10, %cst_8 {dimension_numbers = #tpu.dot_dimension_numbers<[1], [0], [0], [1], [0, 0, 1, 1], [], []>} : vector<8x512xbf16>, vector<512x512xbf16>, vector<8x512xf32> -> vector<8x512xf32>
    %c0_9 = arith.constant 0 : index
    %c0_10 = arith.constant 0 : index
    %12 = vector.load %arg5[%c0_9, %c0_10] : memref<1x512xf32, #tpu.memory_space<vmem>>, vector<1x512xf32>
    %13 = vector.broadcast %12 : vector<1x512xf32> to vector<8x512xf32>
    %14 = arith.addf %11, %13 : vector<8x512xf32>
    %cst_11 = arith.constant 0.000000e+00 : f32
    %15 = vector.broadcast %cst_11 : f32 to vector<8x512xf32>
    %16 = arith.maximumf %14, %15 : vector<8x512xf32>
    %17 = arith.truncf %16 : vector<8x512xf32> to vector<8x512xbf16>
    %c0_12 = arith.constant 0 : index
    %c0_13 = arith.constant 0 : index
    %18 = vector.load %arg6[%c0_12, %c0_13] : memref<512x2xbf16, #tpu.memory_space<vmem>>, vector<512x2xbf16>
    %cst_14 = arith.constant dense<0.000000e+00> : vector<8x2xf32>
    %19 = tpu.matmul %17, %18, %cst_14 {dimension_numbers = #tpu.dot_dimension_numbers<[1], [0], [0], [1], [0, 0, 1, 1], [], []>} : vector<8x512xbf16>, vector<512x2xbf16>, vector<8x2xf32> -> vector<8x2xf32>
    %c0_15 = arith.constant 0 : index
    %c0_16 = arith.constant 0 : index
    %20 = vector.load %arg7[%c0_15, %c0_16] : memref<1x2xf32, #tpu.memory_space<vmem>>, vector<1x2xf32>
    %21 = vector.broadcast %20 : vector<1x2xf32> to vector<8x2xf32>
    %22 = arith.addf %19, %21 : vector<8x2xf32>
    %c0_17 = arith.constant 0 : index
    %c0_18 = arith.constant 0 : index
    %23 = vector.load %arg8[%c0_17, %c0_18] : memref<8x2xf32, #tpu.memory_space<vmem>>, vector<8x2xf32>
    tpu.vector_store %arg8[%c0_17, %c0_18], %22 {strides = array<i32>} : memref<8x2xf32, #tpu.memory_space<vmem>>, vector<8x2xf32>,
    return
  }
  func.func @transform_0(%arg0: i32) -> (i32, i32) {
    %c0_i32 = arith.constant 0 : i32
    %c0_i32_0 = arith.constant 0 : i32
    return %arg0, %c0_i32 : i32, i32
  }
  func.func @transform_1(%arg0: i32) -> (i32, i32) {
    %c0_i32 = arith.constant 0 : i32
    %c0_i32_0 = arith.constant 0 : i32
    %c0_i32_1 = arith.constant 0 : i32
    return %c0_i32, %c0_i32_0 : i32, i32
  }
  func.func @transform_2(%arg0: i32) -> (i32, i32) {
    %c0_i32 = arith.constant 0 : i32
    %c0_i32_0 = arith.constant 0 : i32
    %c0_i32_1 = arith.constant 0 : i32
    return %c0_i32, %c0_i32_0 : i32, i32
  }
  func.func @transform_3(%arg0: i32) -> (i32, i32) {
    %c0_i32 = arith.constant 0 : i32
    %c0_i32_0 = arith.constant 0 : i32
    %c0_i32_1 = arith.constant 0 : i32
    return %c0_i32, %c0_i32_0 : i32, i32
  }
  func.func @transform_4(%arg0: i32) -> (i32, i32) {
    %c0_i32 = arith.constant 0 : i32
    %c0_i32_0 = arith.constant 0 : i32
    %c0_i32_1 = arith.constant 0 : i32
    return %c0_i32, %c0_i32_0 : i32, i32
  }
  func.func @transform_5(%arg0: i32) -> (i32, i32) {
    %c0_i32 = arith.constant 0 : i32
    %c0_i32_0 = arith.constant 0 : i32
    %c0_i32_1 = arith.constant 0 : i32
    return %c0_i32, %c0_i32_0 : i32, i32
  }
  func.func @transform_6(%arg0: i32) -> (i32, i32) {
    %c0_i32 = arith.constant 0 : i32
    %c0_i32_0 = arith.constant 0 : i32
    %c0_i32_1 = arith.constant 0 : i32
    return %c0_i32, %c0_i32_0 : i32, i32
  }
  func.func @transform_7(%arg0: i32) -> (i32, i32) {
    %c0_i32 = arith.constant 0 : i32
    %c0_i32_0 = arith.constant 0 : i32
    return %arg0, %c0_i32 : i32, i32
  }
}

</mosaic_0001>

<bundles_post_ra>
// kernel: neural_network_forward.1
= control target key start
LH: loop header
LB: loop body
LE: loop exit
PB: predicated region body
PF: predicated region fallthrough
CT: control target
= control target key end

     0   :  { %12 = vsyncpa [#allocation3], 0  ;;  %s1965_s24 = smov [#allocation2]   ;;  %s2160_s0 = inlined_call_operand.vmem [shape: f32[8,7], index: 0, kind: input, shape index: {}]   ;;  %s2161_s1 = inlined_call_operand.vmem [shape: bf16[7,512], index: 1, kind: input, shape index: {}]   ;;  %s2162_s2 = inlined_call_operand.vmem [shape: f32[1,512], index: 2, kind: input, shape index: {}]   ;;  %s2163_s3 = inlined_call_operand.hbm [shape: bf16[512,512], index: 3, kind: input, shape index: {}]   ;;  %s2164_s4 = inlined_call_operand.vmem [shape: f32[1,512], index: 4, kind: input, shape index: {}]   ;;  %s2165_s5 = inlined_call_operand.vmem [shape: bf16[512,2], index: 5, kind: input, shape index: {}]   ;;  %s2166_s6 = inlined_call_operand.vmem [shape: f32[1,2], index: 6, kind: input, shape index: {}]   ;;  %s2167_s7 = inlined_call_operand.vmem [shape: f32[8,2], index: 7, kind: output, shape index: {}]  }
   0x1   :  { %s24_s25 = sshll.u32 %s1965_s24, 4  ;;  %s25_s25 = int_to_ptr.vmem [resolvable:$true] %s24_s25 }
   0x2   :  { %s1951_s26 = scalar_lea.vmem %s25_s25, 16384  ;;  %p1956_p1 = scmp.lt.s32.totalorder %s25_s25, %s25_s25 }
   0x3   :  { %p1952_p0 = scmp.ne.s32.totalorder %s25_s25, %s1951_s26  ;;  %p1957_p2 = scmp.lt.s32.totalorder %s1951_s26, %s1951_s26 }
   0x5   :  { %p1958_p3 = por %p1957_p2, %p1956_p1 }
   0x7   :  { %p1959_p4 = pnand %p1958_p3, %p1952_p0 }
   0x9   :  { %1962 = shalt.err (!%p1959_p4)
}
   0xa   :  { %s1966_s27 = smov 256   ;;  %s1967_s28 = smov 16  }
   0xb   :  { %30 = dma.hbm_to_vmem [thread:$0]  %s2163_s3, 16384, %s25_s25, [#allocation3], %s1966_s27, %s1966_s27, %s1967_s28  }
   0xc   :  { %1963 = dma.done.wait [#allocation3], 16384  }
   0xd   :  { %1964 = vsyncadd [#allocation3], 4294950912  ;;  %vm81_vm0 = vcmask 1042432   ;;  %v1968_v0 = vmov 0   ;;  %vm82_vm1 = vcmask 1043456   ;;  %v1969_v1 = vmov 65535  }
   0xe   :  { %129 = vmatprep.mubr.bf16.mxu0 %v1968_v0  ;;  %170 = vmatprep.mubr.bf16.mxu1 %v1968_v0  ;;  %v83_v2 = vsel %vm81_vm0, 4294967295, %v1969_v1  ;;  %v43_v3 = vld [vmem:[%s2161_s1] sm:$0xff]  ;;  %v44_v5 = vld [vmem:[%s2161_s1 + $0x8] sm:$0xff]  ;;  %vm77_vm2 = vcmask 56320   ;;  %vm1492_vm3 = vcmask 15360  }
   0xf   :  { %v84_v4 = vsel %vm82_vm1, %v83_v2, 0  ;;  %v1500_v6 = vcombine.high %v43_v3, %v43_v3  ;;  %v1502_v7 = vcombine.high %v44_v5, %v44_v5  ;;  %v1499_v8 = vcombine.low %v43_v3, %v43_v3  ;;  %v41_v10 = vld [vmem:[%s2160_s0] sm:$0xff] }
  0x10   :  { %v1501_v9 = vcombine.low %v44_v5, %v44_v5  ;;  %v1721_v15 = vld [vmem:[#allocation2 + $0xe4] ss:$16 sps:$4 sm:$0xff]   ;;  %v42_v17 = vpack.c.bf16 %v41_v10, %v41_v10  ;;  %v1719_v18 = vld [vmem:[#allocation2 + $0xe0] ss:$16 sps:$4 sm:$0xff]  }
  0x11   :  { %v89_v11 = vand.u32 %v1500_v6, %v84_v4  ;;  %v95_v12 = vand.u32 %v1502_v7, %v84_v4  ;;  %v86_v13 = vand.u32 %v1499_v8, %v84_v4  ;;  %v1724_v16 = vld [vmem:[#allocation2 + $0x2e4] ss:$16 sps:$4 sm:$0xff]   ;;  %v1722_v19 = vld [vmem:[#allocation2 + $0x2e0] ss:$16 sps:$4 sm:$0xff]  }
  0x12   :  { %v92_v14 = vand.u32 %v1501_v9, %v84_v4  ;;  %v1727_v20 = vld [vmem:[#allocation2 + $0xc4] ss:$16 sps:$4 sm:$0xff]   ;;  %v1725_v22 = vld [vmem:[#allocation2 + $0xc0] ss:$16 sps:$4 sm:$0xff]  }
  0x13   :  { %111 = vmatprep.subr.bf16.mxu0 %v89_v11  ;;  %152 = vmatprep.subr.bf16.mxu1 %v95_v12  ;;  %v1730_v21 = vld [vmem:[#allocation2 + $0x2c4] ss:$16 sps:$4 sm:$0xff]   ;;  %v1728_v23 = vld [vmem:[#allocation2 + $0x2c0] ss:$16 sps:$4 sm:$0xff]  }
  0x14   :  { %112 = vmatpush1.bf16.msra.mxu0 %v86_v13  ;;  %153 = vmatpush1.bf16.msra.mxu1 %v92_v14  ;;  %v1733_v24 = vld [vmem:[#allocation2 + $0xa4] ss:$16 sps:$4 sm:$0xff]   ;;  %v1731_v26 = vld [vmem:[#allocation2 + $0xa0] ss:$16 sps:$4 sm:$0xff]  }
  0x15   :  { %977 = vmatprep.subr.bf16.mxu0 %v1721_v15  ;;  %1018 = vmatprep.subr.bf16.mxu1 %v1724_v16  ;;  %v1736_v25 = vld [vmem:[#allocation2 + $0x2a4] ss:$16 sps:$4 sm:$0xff]   ;;  %v1734_v27 = vld [vmem:[#allocation2 + $0x2a0] ss:$16 sps:$4 sm:$0xff]   ;;  %v1817_v16 = vld [vmem:[#allocation2 + $0xec] ss:$16 sps:$4 sm:$0xff]  }
  0x16   :  { %v1739_v28 = vld [vmem:[#allocation2 + $0x84] ss:$16 sps:$4 sm:$0xff]   ;;  %v1737_v30 = vld [vmem:[#allocation2 + $0x80] ss:$16 sps:$4 sm:$0xff]  }
  0x17   :  { %1503 = vmatmul.mubr.msk.bf16.vlgmr.msra.gmra.mxu0 %vm77_vm2, %v42_v17  ;;  %1504 = vmatmul.mubr.msk.bf16.vlgmr.msra.gmra.mxu1 %vm77_vm2, %v42_v17  ;;  %v1742_v29 = vld [vmem:[#allocation2 + $0x284] ss:$16 sps:$4 sm:$0xff]   ;;  %v1740_v31 = vld [vmem:[#allocation2 + $0x280] ss:$16 sps:$4 sm:$0xff]   ;;  %v1820_v17 = vld [vmem:[#allocation2 + $0x2ec] ss:$16 sps:$4 sm:$0xff]  }
  0x18   :  { %978 = vmatpush1.bf16.msra.mxu0 %v1719_v18  ;;  %1019 = vmatpush1.bf16.msra.mxu1 %v1722_v19  ;;  %v1745_v32 = vld [vmem:[#allocation2 + $0x64] ss:$16 sps:$4 sm:$0xff]   ;;  %v1743_v34 = vld [vmem:[#allocation2 + $0x60] ss:$16 sps:$4 sm:$0xff]   ;;  %v47_v18 = vlaneseq }
  0x19   :  { %979 = vmatprep.subr.bf16.mxu0 %v1727_v20  ;;  %1020 = vmatprep.subr.bf16.mxu1 %v1730_v21  ;;  %v1748_v33 = vld [vmem:[#allocation2 + $0x264] ss:$16 sps:$4 sm:$0xff]   ;;  %v1746_v35 = vld [vmem:[#allocation2 + $0x260] ss:$16 sps:$4 sm:$0xff]  }
  0x1a   :  { %v1751_v36 = vld [vmem:[#allocation2 + $0x44] ss:$16 sps:$4 sm:$0xff]   ;;  %v1749_v38 = vld [vmem:[#allocation2 + $0x40] ss:$16 sps:$4 sm:$0xff]   ;;  %v2022_v19 = vshrl.u32 %v47_v18, 7 }
  0x1b   :  { %v1754_v37 = vld [vmem:[#allocation2 + $0x244] ss:$16 sps:$4 sm:$0xff]   ;;  %v1752_v39 = vld [vmem:[#allocation2 + $0x240] ss:$16 sps:$4 sm:$0xff]   ;;  %v1866_v18 = vld [vmem:[#allocation2 + $0x3e8] ss:$16 sps:$4 sm:$0xff]  }
  0x1c   :  { %980 = vmatpush1.bf16.msra.mxu0 %v1725_v22  ;;  %1021 = vmatpush1.bf16.msra.mxu1 %v1728_v23  ;;  %v1757_v40 = vld [vmem:[#allocation2 + $0x24] ss:$16 sps:$4 sm:$0xff]   ;;  %v1755_v42 = vld [vmem:[#allocation2 + $0x20] ss:$16 sps:$4 sm:$0xff]   ;;  %v49_v20 = vsub.s32 0, %v2022_v19  ;;  %v57_v21 = vsub.s32 2, %v2022_v19 }
  0x1d   :  { %981 = vmatprep.subr.bf16.mxu0 %v1733_v24  ;;  %1022 = vmatprep.subr.bf16.mxu1 %v1736_v25  ;;  %v1760_v41 = vld [vmem:[#allocation2 + $0x224] ss:$16 sps:$4 sm:$0xff]   ;;  %v1758_v43 = vld [vmem:[#allocation2 + $0x220] ss:$16 sps:$4 sm:$0xff]   ;;  %v53_v23 = vsub.s32 1, %v2022_v19  ;;  %v61_v24 = vsub.s32 3, %v2022_v19 }
  0x1e   :  { %v1763_v44 = vld [vmem:[#allocation2 + $0x4] ss:$16 sps:$4 sm:$0xff]   ;;  %v1761_v46 = vld [vmem:[#allocation2] ss:$16 sps:$4 sm:$0xff]  }
  0x1f   :  { %v1766_v45 = vld [vmem:[#allocation2 + $0x204] ss:$16 sps:$4 sm:$0xff]   ;;  %v1764_v47 = vld [vmem:[#allocation2 + $0x200] ss:$16 sps:$4 sm:$0xff]  }
  0x20   :  { %982 = vmatpush1.bf16.msra.mxu0 %v1731_v26  ;;  %1023 = vmatpush1.bf16.msra.mxu1 %v1734_v27  ;;  %v1769_v48 = vld [vmem:[#allocation2 + $0x1e4] ss:$16 sps:$4 sm:$0xff]   ;;  %v1767_v50 = vld [vmem:[#allocation2 + $0x1e0] ss:$16 sps:$4 sm:$0xff]  }
  0x21   :  { %983 = vmatprep.subr.bf16.mxu0 %v1739_v28  ;;  %1024 = vmatprep.subr.bf16.mxu1 %v1742_v29  ;;  %v1772_v49 = vld [vmem:[#allocation2 + $0x3e4] ss:$16 sps:$4 sm:$0xff]   ;;  %v1770_v51 = vld [vmem:[#allocation2 + $0x3e0] ss:$16 sps:$4 sm:$0xff]  }
  0x22   :  { %v1775_v52 = vld [vmem:[#allocation2 + $0x1c4] ss:$16 sps:$4 sm:$0xff]   ;;  %v1773_v54 = vld [vmem:[#allocation2 + $0x1c0] ss:$16 sps:$4 sm:$0xff]  }
  0x23   :  { %v1778_v53 = vld [vmem:[#allocation2 + $0x3c4] ss:$16 sps:$4 sm:$0xff]   ;;  %v1776_v55 = vld [vmem:[#allocation2 + $0x3c0] ss:$16 sps:$4 sm:$0xff]  }
  0x24   :  { %984 = vmatpush1.bf16.msra.mxu0 %v1737_v30  ;;  %1025 = vmatpush1.bf16.msra.mxu1 %v1740_v31  ;;  %v1781_v56 = vld [vmem:[#allocation2 + $0x1a4] ss:$16 sps:$4 sm:$0xff]   ;;  %v1779_v58 = vld [vmem:[#allocation2 + $0x1a0] ss:$16 sps:$4 sm:$0xff]  }
  0x25   :  { %985 = vmatprep.subr.bf16.mxu0 %v1745_v32  ;;  %1026 = vmatprep.subr.bf16.mxu1 %v1748_v33  ;;  %v1784_v57 = vld [vmem:[#allocation2 + $0x3a4] ss:$16 sps:$4 sm:$0xff]   ;;  %v1782_v59 = vld [vmem:[#allocation2 + $0x3a0] ss:$16 sps:$4 sm:$0xff]  }
  0x26   :  { %v1787_v60 = vld [vmem:[#allocation2 + $0x184] ss:$16 sps:$4 sm:$0xff]   ;;  %v1785_v62 = vld [vmem:[#allocation2 + $0x180] ss:$16 sps:$4 sm:$0xff]  }
  0x27   :  { %v1790_v61 = vld [vmem:[#allocation2 + $0x384] ss:$16 sps:$4 sm:$0xff]   ;;  %v1788_v63 = vld [vmem:[#allocation2 + $0x380] ss:$16 sps:$4 sm:$0xff]  }
  0x28   :  { %986 = vmatpush1.bf16.msra.mxu0 %v1743_v34  ;;  %1027 = vmatpush1.bf16.msra.mxu1 %v1746_v35  ;;  %v1793_v0 = vld [vmem:[#allocation2 + $0x164] ss:$16 sps:$4 sm:$0xff]   ;;  %v1791_v2 = vld [vmem:[#allocation2 + $0x160] ss:$16 sps:$4 sm:$0xff]  }
  0x29   :  { %987 = vmatprep.subr.bf16.mxu0 %v1751_v36  ;;  %1028 = vmatprep.subr.bf16.mxu1 %v1754_v37  ;;  %v1796_v1 = vld [vmem:[#allocation2 + $0x364] ss:$16 sps:$4 sm:$0xff]   ;;  %v1794_v3 = vld [vmem:[#allocation2 + $0x360] ss:$16 sps:$4 sm:$0xff]  }
  0x2a   :  { %v1799_v4 = vld [vmem:[#allocation2 + $0x144] ss:$16 sps:$4 sm:$0xff]   ;;  %v1797_v6 = vld [vmem:[#allocation2 + $0x140] ss:$16 sps:$4 sm:$0xff]  }
  0x2b   :  { %v1802_v5 = vld [vmem:[#allocation2 + $0x344] ss:$16 sps:$4 sm:$0xff]   ;;  %v1800_v7 = vld [vmem:[#allocation2 + $0x340] ss:$16 sps:$4 sm:$0xff]  }
  0x2c   :  { %988 = vmatpush1.bf16.msra.mxu0 %v1749_v38  ;;  %1029 = vmatpush1.bf16.msra.mxu1 %v1752_v39  ;;  %v1805_v8 = vld [vmem:[#allocation2 + $0x124] ss:$16 sps:$4 sm:$0xff]   ;;  %v1803_v10 = vld [vmem:[#allocation2 + $0x120] ss:$16 sps:$4 sm:$0xff]  }
  0x2d   :  { %989 = vmatprep.subr.bf16.mxu0 %v1757_v40  ;;  %1030 = vmatprep.subr.bf16.mxu1 %v1760_v41  ;;  %v1808_v9 = vld [vmem:[#allocation2 + $0x324] ss:$16 sps:$4 sm:$0xff]   ;;  %v1806_v11 = vld [vmem:[#allocation2 + $0x320] ss:$16 sps:$4 sm:$0xff]  }
  0x2e   :  { %v1811_v12 = vld [vmem:[#allocation2 + $0x104] ss:$16 sps:$4 sm:$0xff]   ;;  %v1809_v14 = vld [vmem:[#allocation2 + $0x100] ss:$16 sps:$4 sm:$0xff]  }
  0x2f   :  { %v1814_v13 = vld [vmem:[#allocation2 + $0x304] ss:$16 sps:$4 sm:$0xff]   ;;  %v1812_v15 = vld [vmem:[#allocation2 + $0x300] ss:$16 sps:$4 sm:$0xff]  }
  0x30   :  { %990 = vmatpush1.bf16.msra.mxu0 %v1755_v42  ;;  %1031 = vmatpush1.bf16.msra.mxu1 %v1758_v43  ;;  %v45_v22 = vld [vmem:[%s2162_s2] sm:$0xf] }
  0x31   :  { %991 = vmatprep.subr.bf16.mxu0 %v1763_v44  ;;  %1032 = vmatprep.subr.bf16.mxu1 %v1766_v45  ;;  %v50_v25 = vrot.slane %v45_v22, %v49_v20  ;;  %v58_v26 = vrot.slane %v45_v22, %v57_v21  ;;  %v54_v27 = vrot.slane %v45_v22, %v53_v23 }
  0x32   :  { %v62_v28 = vrot.slane %v45_v22, %v61_v24  ;;  %v1871_v22 = vld [vmem:[#allocation2 + $0x1cc] ss:$16 sps:$4 sm:$0xff]  }
  0x34   :  { %992 = vmatpush1.bf16.msra.mxu0 %v1761_v46  ;;  %1033 = vmatpush1.bf16.msra.mxu1 %v1764_v47 }
  0x35   :  { %993 = vmatprep.subr.bf16.mxu0 %v1769_v48  ;;  %1034 = vmatprep.subr.bf16.mxu1 %v1772_v49  ;;  %v1815_v48 = vld [vmem:[#allocation2 + $0xe8] ss:$16 sps:$4 sm:$0xff]  }
  0x36   :  { %v1818_v49 = vld [vmem:[#allocation2 + $0x2e8] ss:$16 sps:$4 sm:$0xff]  }
  0x38   :  { %994 = vmatpush2.bf16.msra.mxu0 %v1767_v50  ;;  %1035 = vmatpush2.bf16.msra.mxu1 %v1770_v51  ;;  %v1823_v51 = vld [vmem:[#allocation2 + $0xcc] ss:$16 sps:$4 sm:$0xff]  }
  0x39   :  { %995 = vmatprep.subr.bf16.mxu0 %v1775_v52  ;;  %1036 = vmatprep.subr.bf16.mxu1 %v1778_v53  ;;  %v1826_v52 = vld [vmem:[#allocation2 + $0x2cc] ss:$16 sps:$4 sm:$0xff]   ;;  %v1821_v53 = vld [vmem:[#allocation2 + $0xc8] ss:$16 sps:$4 sm:$0xff]  }
  0x3c   :  { %996 = vmatpush2.bf16.msra.mxu0 %v1773_v54  ;;  %1037 = vmatpush2.bf16.msra.mxu1 %v1776_v55  ;;  %v1824_v54 = vld [vmem:[#allocation2 + $0x2c8] ss:$16 sps:$4 sm:$0xff]   ;;  %v1829_v55 = vld [vmem:[#allocation2 + $0xac] ss:$16 sps:$4 sm:$0xff]  }
  0x3d   :  { %997 = vmatprep.subr.bf16.mxu0 %v1781_v56  ;;  %1038 = vmatprep.subr.bf16.mxu1 %v1784_v57  ;;  %v1832_v56 = vld [vmem:[#allocation2 + $0x2ac] ss:$16 sps:$4 sm:$0xff]   ;;  %v1827_v57 = vld [vmem:[#allocation2 + $0xa8] ss:$16 sps:$4 sm:$0xff]  }
  0x40   :  { %998 = vmatpush2.bf16.msra.mxu0 %v1779_v58  ;;  %1039 = vmatpush2.bf16.msra.mxu1 %v1782_v59  ;;  %v1830_v58 = vld [vmem:[#allocation2 + $0x2a8] ss:$16 sps:$4 sm:$0xff]   ;;  %v1835_v59 = vld [vmem:[#allocation2 + $0x8c] ss:$16 sps:$4 sm:$0xff]  }
  0x41   :  { %999 = vmatprep.subr.bf16.mxu0 %v1787_v60  ;;  %1040 = vmatprep.subr.bf16.mxu1 %v1790_v61  ;;  %v1838_v60 = vld [vmem:[#allocation2 + $0x28c] ss:$16 sps:$4 sm:$0xff]   ;;  %v1833_v61 = vld [vmem:[#allocation2 + $0x88] ss:$16 sps:$4 sm:$0xff]  }
  0x44   :  { %1000 = vmatpush2.bf16.msra.mxu0 %v1785_v62  ;;  %1041 = vmatpush2.bf16.msra.mxu1 %v1788_v63  ;;  %v1836_v62 = vld [vmem:[#allocation2 + $0x288] ss:$16 sps:$4 sm:$0xff]   ;;  %v1841_v63 = vld [vmem:[#allocation2 + $0x6c] ss:$16 sps:$4 sm:$0xff]  }
  0x45   :  { %1001 = vmatprep.subr.bf16.mxu0 %v1793_v0  ;;  %1042 = vmatprep.subr.bf16.mxu1 %v1796_v1  ;;  %v1844_v0 = vld [vmem:[#allocation2 + $0x26c] ss:$16 sps:$4 sm:$0xff]   ;;  %v1839_v1 = vld [vmem:[#allocation2 + $0x68] ss:$16 sps:$4 sm:$0xff]  }
  0x48   :  { %1002 = vmatpush2.bf16.msra.mxu0 %v1791_v2  ;;  %1043 = vmatpush2.bf16.msra.mxu1 %v1794_v3  ;;  %v1842_v2 = vld [vmem:[#allocation2 + $0x268] ss:$16 sps:$4 sm:$0xff]   ;;  %v1847_v3 = vld [vmem:[#allocation2 + $0x4c] ss:$16 sps:$4 sm:$0xff]  }
  0x49   :  { %1003 = vmatprep.subr.bf16.mxu0 %v1799_v4  ;;  %1044 = vmatprep.subr.bf16.mxu1 %v1802_v5  ;;  %v1850_v4 = vld [vmem:[#allocation2 + $0x24c] ss:$16 sps:$4 sm:$0xff]   ;;  %v1845_v5 = vld [vmem:[#allocation2 + $0x48] ss:$16 sps:$4 sm:$0xff]  }
  0x4c   :  { %1004 = vmatpush2.bf16.msra.mxu0 %v1797_v6  ;;  %1045 = vmatpush2.bf16.msra.mxu1 %v1800_v7  ;;  %v1848_v6 = vld [vmem:[#allocation2 + $0x248] ss:$16 sps:$4 sm:$0xff]   ;;  %v1853_v7 = vld [vmem:[#allocation2 + $0x2c] ss:$16 sps:$4 sm:$0xff]  }
  0x4d   :  { %1005 = vmatprep.subr.bf16.mxu0 %v1805_v8  ;;  %1046 = vmatprep.subr.bf16.mxu1 %v1808_v9  ;;  %v1856_v8 = vld [vmem:[#allocation2 + $0x22c] ss:$16 sps:$4 sm:$0xff]   ;;  %v1851_v9 = vld [vmem:[#allocation2 + $0x28] ss:$16 sps:$4 sm:$0xff]  }
  0x50   :  { %1006 = vmatpush2.bf16.msra.mxu0 %v1803_v10  ;;  %1047 = vmatpush2.bf16.msra.mxu1 %v1806_v11  ;;  %v1854_v10 = vld [vmem:[#allocation2 + $0x228] ss:$16 sps:$4 sm:$0xff]   ;;  %v1859_v11 = vld [vmem:[#allocation2 + $0xc] ss:$16 sps:$4 sm:$0xff]  }
  0x51   :  { %1007 = vmatprep.subr.bf16.mxu0 %v1811_v12  ;;  %1048 = vmatprep.subr.bf16.mxu1 %v1814_v13  ;;  %v1862_v12 = vld [vmem:[#allocation2 + $0x20c] ss:$16 sps:$4 sm:$0xff]   ;;  %v1857_v13 = vld [vmem:[#allocation2 + $0x8] ss:$16 sps:$4 sm:$0xff]  }
  0x54   :  { %1008 = vmatpush2.bf16.msra.mxu0 %v1809_v14  ;;  %1049 = vmatpush2.bf16.msra.mxu1 %v1812_v15  ;;  %v1860_v14 = vld [vmem:[#allocation2 + $0x208] ss:$16 sps:$4 sm:$0xff]   ;;  %v1865_v15 = vld [vmem:[#allocation2 + $0x1ec] ss:$16 sps:$4 sm:$0xff]  }
  0x55   :  { %1059 = vmatprep.subr.bf16.mxu0 %v1817_v16  ;;  %1100 = vmatprep.subr.bf16.mxu1 %v1820_v17  ;;  %v1868_v16 = vld [vmem:[#allocation2 + $0x3ec] ss:$16 sps:$4 sm:$0xff]   ;;  %v1863_v17 = vld [vmem:[#allocation2 + $0x1e8] ss:$16 sps:$4 sm:$0xff]  }
  0xd7   :  { %v131_v29 = vpop.f32.mrf.mxu0  ;;  %v172_v30 = vpop.f32.mrf.mxu1 }
  0xd8   :  { %v132_v31 = vadd.f32 %v131_v29, %v50_v25  ;;  %v173_v32 = vadd.f32 %v172_v30, %v58_v26  ;;  %v1874_v25 = vld [vmem:[#allocation2 + $0x3cc] ss:$16 sps:$4 sm:$0xff]   ;;  %v1869_v26 = vld [vmem:[#allocation2 + $0x1c8] ss:$16 sps:$4 sm:$0xff]  }
  0xd9   :  { %v133_v33 = vpop.f32.mrf.mxu0  ;;  %v174_v34 = vpop.f32.mrf.mxu1  ;;  %v1880_v29 = vld [vmem:[#allocation2 + $0x3ac] ss:$16 sps:$4 sm:$0xff]   ;;  %v1875_v30 = vld [vmem:[#allocation2 + $0x1a8] ss:$16 sps:$4 sm:$0xff]  }
  0xda   :  { %v181_v35 = vmax.f32 %v173_v32, 0.0  ;;  %v134_v36 = vadd.f32 %v133_v33, %v54_v27  ;;  %v175_v37 = vadd.f32 %v174_v34, %v62_v28  ;;  %v179_v38 = vmax.f32 %v132_v31, 0.0  ;;  %v1872_v27 = vld [vmem:[#allocation2 + $0x3c8] ss:$16 sps:$4 sm:$0xff]   ;;  %v1877_v28 = vld [vmem:[#allocation2 + $0x1ac] ss:$16 sps:$4 sm:$0xff]  }
  0xdb   :  { %v135_v39 = vpop.f32.mrf.mxu0  ;;  %v176_v40 = vpop.f32.mrf.mxu1  ;;  %v1878_v31 = vld [vmem:[#allocation2 + $0x3a8] ss:$16 sps:$4 sm:$0xff]   ;;  %v1883_v32 = vld [vmem:[#allocation2 + $0x18c] ss:$16 sps:$4 sm:$0xff]  }
  0xdc   :  { %v180_v41 = vmax.f32 %v134_v36, 0.0  ;;  %v182_v42 = vmax.f32 %v175_v37, 0.0  ;;  %v2039_v43 = vpack.c.bf16 %v181_v35, %v181_v35  ;;  %v2041_v50 = vpack.c.bf16 %v179_v38, %v179_v38  ;;  %v1886_v33 = vld [vmem:[#allocation2 + $0x38c] ss:$16 sps:$4 sm:$0xff]   ;;  %v1881_v34 = vld [vmem:[#allocation2 + $0x188] ss:$16 sps:$4 sm:$0xff]  }
  0xdd   :  { %v136_v44 = vpop.f32.mrf.mxu0  ;;  %v177_v45 = vpop.f32.mrf.mxu1  ;;  %v1884_v35 = vld [vmem:[#allocation2 + $0x388] ss:$16 sps:$4 sm:$0xff]   ;;  %v1889_v36 = vld [vmem:[#allocation2 + $0x16c] ss:$16 sps:$4 sm:$0xff]  }
  0xde   :  { %v184_v46 = vpack.c.bf16 %v180_v41, %v180_v41  ;;  %v186_v47 = vpack.c.bf16 %v182_v42, %v182_v42  ;;  %v1892_v37 = vld [vmem:[#allocation2 + $0x36c] ss:$16 sps:$4 sm:$0xff]   ;;  %v1887_v38 = vld [vmem:[#allocation2 + $0x168] ss:$16 sps:$4 sm:$0xff]  }
  0xdf   :  { %v1890_v39 = vld [vmem:[#allocation2 + $0x368] ss:$16 sps:$4 sm:$0xff]   ;;  %v1895_v40 = vld [vmem:[#allocation2 + $0x14c] ss:$16 sps:$4 sm:$0xff]  }
  0xe0   :  { %1009 = vmatprep.mubr.bf16.mxu0 %v184_v46  ;;  %1050 = vmatprep.mubr.bf16.mxu1 %v186_v47  ;;  %v1898_v41 = vld [vmem:[#allocation2 + $0x34c] ss:$16 sps:$4 sm:$0xff]   ;;  %v1893_v42 = vld [vmem:[#allocation2 + $0x148] ss:$16 sps:$4 sm:$0xff]  }
  0xe1   :  { %1010 = vmatmul.mubr.bf16.vlgmr.msra.gmra.mxu0 %v2041_v50  ;;  %1051 = vmatmul.mubr.bf16.vlgmr.msra.gmra.mxu1 %v2039_v43  ;;  %v1896_v44 = vld [vmem:[#allocation2 + $0x348] ss:$16 sps:$4 sm:$0xff]   ;;  %v1901_v45 = vld [vmem:[#allocation2 + $0x12c] ss:$16 sps:$4 sm:$0xff]  }
  0xe2   :  { %1060 = vmatpush1.bf16.msra.mxu0 %v1815_v48  ;;  %1101 = vmatpush1.bf16.msra.mxu1 %v1818_v49  ;;  %v1902_v48 = vld [vmem:[#allocation2 + $0x328] ss:$16 sps:$4 sm:$0xff]   ;;  %v1907_v49 = vld [vmem:[#allocation2 + $0x10c] ss:$16 sps:$4 sm:$0xff]  }
  0xe3   :  { %1091 = vmatprep.mubr.bf16.mxu0 %v184_v46  ;;  %1132 = vmatprep.mubr.bf16.mxu1 %v186_v47  ;;  %v1904_v46 = vld [vmem:[#allocation2 + $0x32c] ss:$16 sps:$4 sm:$0xff]   ;;  %v1899_v47 = vld [vmem:[#allocation2 + $0x128] ss:$16 sps:$4 sm:$0xff]  }
  0xe4   :  { %1061 = vmatprep.subr.bf16.mxu0 %v1823_v51  ;;  %1102 = vmatprep.subr.bf16.mxu1 %v1826_v52  ;;  %v1910_v51 = vld [vmem:[#allocation2 + $0x30c] ss:$16 sps:$4 sm:$0xff]   ;;  %v1905_v52 = vld [vmem:[#allocation2 + $0x108] ss:$16 sps:$4 sm:$0xff]  }
  0xe6   :  { %1062 = vmatpush1.bf16.msra.mxu0 %v1821_v53  ;;  %1103 = vmatpush1.bf16.msra.mxu1 %v1824_v54  ;;  %v1908_v53 = vld [vmem:[#allocation2 + $0x308] ss:$16 sps:$4 sm:$0xff]  }
  0xe7   :  { %1063 = vmatprep.subr.bf16.mxu0 %v1829_v55  ;;  %1104 = vmatprep.subr.bf16.mxu1 %v1832_v56  ;;  %v1911_v54 = vld [vmem:[%s2165_s5 + $0x78] sm:$0xff]   ;;  %v1913_v56 = vld [vmem:[%s2165_s5 + $0x70] sm:$0xff]  }
  0xe8   :  { %v1912_v55 = vld [vmem:[%s2165_s5 + $0x38] sm:$0xff]  }
  0xea   :  { %1064 = vmatpush1.bf16.msra.mxu0 %v1827_v57  ;;  %1105 = vmatpush1.bf16.msra.mxu1 %v1830_v58  ;;  %v1914_v57 = vld [vmem:[%s2165_s5 + $0x30] sm:$0xff]   ;;  %v1915_v58 = vld [vmem:[%s2165_s5 + $0x68] sm:$0xff]  }
  0xeb   :  { %1065 = vmatprep.subr.bf16.mxu0 %v1835_v59  ;;  %1106 = vmatprep.subr.bf16.mxu1 %v1838_v60  ;;  %v1916_v59 = vld [vmem:[%s2165_s5 + $0x28] sm:$0xff]   ;;  %v1919_v60 = vld [vmem:[%s2165_s5 + $0x58] sm:$0xff]  }
  0xee   :  { %1066 = vmatpush1.bf16.msra.mxu0 %v1833_v61  ;;  %1107 = vmatpush1.bf16.msra.mxu1 %v1836_v62  ;;  %v1927_v61 = vld [vmem:[%s2165_s5 + $0xf8] sm:$0xff]  }
  0xef   :  { %1067 = vmatprep.subr.bf16.mxu0 %v1841_v63  ;;  %1108 = vmatprep.subr.bf16.mxu1 %v1844_v0  ;;  %v1928_v62 = vld [vmem:[%s2165_s5 + $0xb8] sm:$0xff]   ;;  %v1929_v63 = vld [vmem:[%s2165_s5 + $0xf0] sm:$0xff]  }
  0xf0   :  { %v1920_v0 = vld [vmem:[%s2165_s5 + $0x18] sm:$0xff]  }
  0xf2   :  { %1068 = vmatpush1.bf16.msra.mxu0 %v1839_v1  ;;  %1109 = vmatpush1.bf16.msra.mxu1 %v1842_v2  ;;  %v1921_v1 = vld [vmem:[%s2165_s5 + $0x50] sm:$0xff]  }
  0xf3   :  { %1069 = vmatprep.subr.bf16.mxu0 %v1847_v3  ;;  %1110 = vmatprep.subr.bf16.mxu1 %v1850_v4  ;;  %v1930_v2 = vld [vmem:[%s2165_s5 + $0xb0] sm:$0xff]   ;;  %v1931_v3 = vld [vmem:[%s2165_s5 + $0xe8] sm:$0xff]  }
  0xf4   :  { %v1922_v4 = vld [vmem:[%s2165_s5 + $0x10] sm:$0xff]  }
  0xf6   :  { %1070 = vmatpush1.bf16.msra.mxu0 %v1845_v5  ;;  %1111 = vmatpush1.bf16.msra.mxu1 %v1848_v6  ;;  %v1923_v5 = vld [vmem:[%s2165_s5 + $0x48] sm:$0xff]  }
  0xf7   :  { %1071 = vmatprep.subr.bf16.mxu0 %v1853_v7  ;;  %1112 = vmatprep.subr.bf16.mxu1 %v1856_v8  ;;  %v1932_v6 = vld [vmem:[%s2165_s5 + $0xa8] sm:$0xff]   ;;  %v1933_v7 = vld [vmem:[%s2165_s5 + $0xe0] sm:$0xff]  }
  0xf8   :  { %v1924_v8 = vld [vmem:[%s2165_s5 + $0x8] sm:$0xff]  }
  0xfa   :  { %1072 = vmatpush1.bf16.msra.mxu0 %v1851_v9  ;;  %1113 = vmatpush1.bf16.msra.mxu1 %v1854_v10  ;;  %v1925_v9 = vld [vmem:[%s2165_s5 + $0x40] sm:$0xff]  }
  0xfb   :  { %1073 = vmatprep.subr.bf16.mxu0 %v1859_v11  ;;  %1114 = vmatprep.subr.bf16.mxu1 %v1862_v12  ;;  %v1934_v10 = vld [vmem:[%s2165_s5 + $0xa0] sm:$0xff]   ;;  %v1935_v11 = vld [vmem:[%s2165_s5 + $0xd8] sm:$0xff]  }
  0xfc   :  { %v1926_v12 = vld [vmem:[%s2165_s5] sm:$0xff]  }
  0xfe   :  { %1074 = vmatpush1.bf16.msra.mxu0 %v1857_v13  ;;  %1115 = vmatpush1.bf16.msra.mxu1 %v1860_v14  ;;  %v1936_v13 = vld [vmem:[%s2165_s5 + $0x98] sm:$0xff]   ;;  %v1937_v14 = vld [vmem:[%s2165_s5 + $0xd0] sm:$0xff]  }
  0xff   :  { %1075 = vmatprep.subr.bf16.mxu0 %v1865_v15  ;;  %1116 = vmatprep.subr.bf16.mxu1 %v1868_v16  ;;  %v1938_v15 = vld [vmem:[%s2165_s5 + $0x90] sm:$0xff]   ;;  %v1939_v16 = vld [vmem:[%s2165_s5 + $0xc8] sm:$0xff]  }
 0x102   :  { %1076 = vmatpush2.bf16.msra.mxu0 %v1863_v17  ;;  %1117 = vmatpush2.bf16.msra.mxu1 %v1866_v18  ;;  %v1940_v17 = vld [vmem:[%s2165_s5 + $0x88] sm:$0xff]   ;;  %v1941_v18 = vld [vmem:[%s2165_s5 + $0xc0] sm:$0xff]  }
 0x103   :  { %1077 = vmatprep.subr.bf16.mxu0 %v1871_v22  ;;  %1118 = vmatprep.subr.bf16.mxu1 %v1874_v25  ;;  %v1942_v22 = vld [vmem:[%s2165_s5 + $0x80] sm:$0xff]  }
 0x104   :  { %v315_v25 = vld [vmem:[%s2164_s4] sm:$0xf] }
 0x106   :  { %1078 = vmatpush2.bf16.msra.mxu0 %v1869_v26  ;;  %1119 = vmatpush2.bf16.msra.mxu1 %v1872_v27  ;;  %v320_v26 = vrot.slane %v315_v25, %v49_v20  ;;  %v324_v27 = vrot.slane %v315_v25, %v53_v23  ;;  %v328_v20 = vrot.slane %v315_v25, %v57_v21 }
 0x107   :  { %1079 = vmatprep.subr.bf16.mxu0 %v1877_v28  ;;  %1120 = vmatprep.subr.bf16.mxu1 %v1880_v29  ;;  %v332_v23 = vrot.slane %v315_v25, %v61_v24 }
 0x10a   :  { %1080 = vmatpush2.bf16.msra.mxu0 %v1875_v30  ;;  %1121 = vmatpush2.bf16.msra.mxu1 %v1878_v31 }
 0x10b   :  { %1081 = vmatprep.subr.bf16.mxu0 %v1883_v32  ;;  %1122 = vmatprep.subr.bf16.mxu1 %v1886_v33 }
 0x10e   :  { %1082 = vmatpush2.bf16.msra.mxu0 %v1881_v34  ;;  %1123 = vmatpush2.bf16.msra.mxu1 %v1884_v35 }
 0x10f   :  { %1083 = vmatprep.subr.bf16.mxu0 %v1889_v36  ;;  %1124 = vmatprep.subr.bf16.mxu1 %v1892_v37 }
 0x112   :  { %1084 = vmatpush2.bf16.msra.mxu0 %v1887_v38  ;;  %1125 = vmatpush2.bf16.msra.mxu1 %v1890_v39 }
 0x113   :  { %1085 = vmatprep.subr.bf16.mxu0 %v1895_v40  ;;  %1126 = vmatprep.subr.bf16.mxu1 %v1898_v41 }
 0x116   :  { %1086 = vmatpush2.bf16.msra.mxu0 %v1893_v42  ;;  %1127 = vmatpush2.bf16.msra.mxu1 %v1896_v44 }
 0x117   :  { %1087 = vmatprep.subr.bf16.mxu0 %v1901_v45  ;;  %1128 = vmatprep.subr.bf16.mxu1 %v1904_v46 }
 0x11a   :  { %1088 = vmatpush2.bf16.msra.mxu0 %v1899_v47  ;;  %1129 = vmatpush2.bf16.msra.mxu1 %v1902_v48 }
 0x11b   :  { %1089 = vmatprep.subr.bf16.mxu0 %v1907_v49  ;;  %1130 = vmatprep.subr.bf16.mxu1 %v1910_v51 }
 0x11e   :  { %1090 = vmatpush2.bf16.msra.mxu0 %v1905_v52  ;;  %1131 = vmatpush2.bf16.msra.mxu1 %v1908_v53 }
 0x11f   :  { %1666 = vmatprep.subr.bf16.mxu0 %v1911_v54  ;;  %1688 = vmatprep.subr.bf16.mxu1 %v1927_v61 }
 0x121   :  { %1092 = vmatmul.mubr.bf16.vlgmr.msra.gmra.mxu0 %v2041_v50  ;;  %1133 = vmatmul.mubr.bf16.vlgmr.msra.gmra.mxu1 %v2039_v43  ;;  %v1917_v43 = vld [vmem:[%s2165_s5 + $0x60] sm:$0xff]  }
 0x122   :  { %1667 = vmatpush3.bf16.msra.mxu0 %v1912_v55  ;;  %v1918_v50 = vld [vmem:[%s2165_s5 + $0x20] sm:$0xff]   ;;  %1689 = vmatpush3.bf16.msra.mxu1 %v1928_v62 }
 0x123   :  { %1668 = vmatprep.subr.bf16.mxu0 %v1913_v56  ;;  %1690 = vmatprep.subr.bf16.mxu1 %v1929_v63  ;;  %v1633_v62 = vld [vmem:[%s2166_s6] ss:$0 sm:$0xff] }
 0x126   :  { %1669 = vmatpush3.bf16.msra.mxu0 %v1914_v57  ;;  %1691 = vmatpush3.bf16.msra.mxu1 %v1930_v2 }
 0x127   :  { %1670 = vmatprep.subr.bf16.mxu0 %v1915_v58  ;;  %1692 = vmatprep.subr.bf16.mxu1 %v1931_v3 }
 0x12a   :  { %1671 = vmatpush3.bf16.msra.mxu0 %v1916_v59  ;;  %1693 = vmatpush3.bf16.msra.mxu1 %v1932_v6 }
 0x12b   :  { %1672 = vmatprep.subr.bf16.mxu0 %v1917_v43  ;;  %1694 = vmatprep.subr.bf16.mxu1 %v1933_v7 }
 0x12e   :  { %1673 = vmatpush3.bf16.msra.mxu0 %v1918_v50  ;;  %1695 = vmatpush3.bf16.msra.mxu1 %v1934_v10 }
 0x12f   :  { %1674 = vmatprep.subr.bf16.mxu0 %v1919_v60  ;;  %1696 = vmatprep.subr.bf16.mxu1 %v1935_v11 }
 0x132   :  { %1675 = vmatpush3.bf16.msra.mxu0 %v1920_v0  ;;  %1697 = vmatpush3.bf16.msra.mxu1 %v1936_v13 }
 0x133   :  { %1676 = vmatprep.subr.bf16.mxu0 %v1921_v1  ;;  %1698 = vmatprep.subr.bf16.mxu1 %v1937_v14 }
 0x136   :  { %1677 = vmatpush3.bf16.msra.mxu0 %v1922_v4  ;;  %1699 = vmatpush3.bf16.msra.mxu1 %v1938_v15 }
 0x137   :  { %1678 = vmatprep.subr.bf16.mxu0 %v1923_v5  ;;  %1700 = vmatprep.subr.bf16.mxu1 %v1939_v16 }
 0x13a   :  { %1679 = vmatpush3.bf16.msra.mxu0 %v1924_v8  ;;  %1701 = vmatpush3.bf16.msra.mxu1 %v1940_v17 }
 0x13b   :  { %1680 = vmatprep.subr.bf16.mxu0 %v1925_v9  ;;  %1702 = vmatprep.subr.bf16.mxu1 %v1941_v18 }
 0x13e   :  { %1681 = vmatpush3.bf16.msra.mxu0 %v1926_v12  ;;  %1703 = vmatpush3.bf16.msra.mxu1 %v1942_v22 }
 0x1a1   :  { %v1011_v28 = vpop.f32.mrf.mxu0  ;;  %v1052_v29 = vpop.f32.mrf.mxu1 }
 0x1a2   :  { %v1012_v30 = vadd.f32 %v1011_v28, %v320_v26 }
 0x1a3   :  { %v1013_v31 = vpop.f32.mrf.mxu0  ;;  %v1054_v32 = vpop.f32.mrf.mxu1 }
 0x1a4   :  { %v1053_v33 = vadd.f32 %v1052_v29, %v1012_v30  ;;  %v1014_v34 = vadd.f32 %v1013_v31, %v324_v27 }
 0x1a5   :  { %v1015_v35 = vpop.f32.mrf.mxu0  ;;  %v1056_v36 = vpop.f32.mrf.mxu1 }
 0x1a6   :  { %v1055_v37 = vadd.f32 %v1054_v32, %v1014_v34  ;;  %v1141_v38 = vmax.f32 %v1053_v33, 0.0 }
 0x1a7   :  { %v1016_v39 = vpop.f32.mrf.mxu0  ;;  %v1057_v40 = vpop.f32.mrf.mxu1 }
 0x1a8   :  { %v1142_v41 = vmax.f32 %v1055_v37, 0.0  ;;  %v1145_v44 = vpack.c.bf16 %v1141_v38, %v1141_v38 }
 0x1aa   :  { %v1146_v42 = vpack.c.bf16 %v1142_v41, %v1142_v41 }
 0x1ac   :  { %1444 = vmatprep.mubr.bf16.mxu0 %v1146_v42 }
 0x1ad   :  { %1445 = vmatmul.mubr.bf16.vlgmr.msra.gmra.mxu0 %v1145_v44 }
 0x1e1   :  { %v1093_v45 = vpop.f32.mrf.mxu0  ;;  %v1134_v46 = vpop.f32.mrf.mxu1 }
 0x1e2   :  { %v1094_v47 = vadd.f32 %v1093_v45, %v328_v20 }
 0x1e3   :  { %v1095_v48 = vpop.f32.mrf.mxu0  ;;  %v1136_v49 = vpop.f32.mrf.mxu1 }
 0x1e4   :  { %v1135_v51 = vadd.f32 %v1134_v46, %v1094_v47  ;;  %v1096_v52 = vadd.f32 %v1095_v48, %v332_v23 }
 0x1e5   :  { %v1097_v53 = vpop.f32.mrf.mxu0  ;;  %v1138_v54 = vpop.f32.mrf.mxu1 }
 0x1e6   :  { %v1137_v55 = vadd.f32 %v1136_v49, %v1096_v52  ;;  %v1143_v56 = vmax.f32 %v1135_v51, 0.0 }
 0x1e7   :  { %v1098_v57 = vpop.f32.mrf.mxu0  ;;  %v1139_v58 = vpop.f32.mrf.mxu1 }
 0x1e8   :  { %v1144_v59 = vmax.f32 %v1137_v55, 0.0  ;;  %v1147_v50 = vpack.c.bf16 %v1143_v56, %v1143_v56 }
 0x1ea   :  { %v1148_v43 = vpack.c.bf16 %v1144_v59, %v1144_v59 }
 0x1ec   :  { %1484 = vmatprep.mubr.bf16.mxu1 %v1148_v43 }
 0x1ed   :  { %1485 = vmatmul.mubr.bf16.vlgmr.msra.gmra.mxu1 %v1147_v50 }
 0x26d   :  { %v1682_v19 = vpop.f32.mrf.mxu0 }
 0x26f   :  { %v1683_v21 = vpop.f32.mrf.mxu0 }
 0x270   :  { %v1684_v61 = vadd.f32 %v1683_v21, %v1682_v19 }
 0x271   :  { %v1685_v24 = vpop.f32.mrf.mxu0 }
 0x272   :  { %v1447_v1 = vadd.f32 %v1684_v61, %v1633_v62 }
 0x273   :  { %v1686_v60 = vpop.f32.mrf.mxu0 }
 0x2ad   :  { %v1704_v63 = vpop.f32.mrf.mxu1 }
 0x2af   :  { %v1705_v0 = vpop.f32.mrf.mxu1 }
 0x2b0   :  { %v1706_v2 = vadd.f32 %v1705_v0, %v1704_v63 }
 0x2b1   :  { %v1707_v3 = vpop.f32.mrf.mxu1 }
 0x2b2   :  { %v1487_v4 = vadd.f32 %v1706_v2, %v1447_v1 }
 0x2b3   :  { %v1708_v5 = vpop.f32.mrf.mxu1 }
 0x2b4   :  { %1493 = vst.msk [vmem:[%s2167_s7] sm:$0xff] %vm1492_vm3, %v1487_v4 }
 0x2b5   :  { %1498 = vsyncpa [#allocation3], 1 }

</bundles_post_ra>
